<compile_context>
chip_gen: v7x
topology: tpu7x:2x2x1
jax: 0.10.0
libtpu: 0.0.40
codegen_flags: <defaults>
</compile_context>

<pallas_src>
import functools

import jax
import jax.numpy as jnp
from jax.experimental import pallas as pl
from jax.experimental.pallas import tpu as pltpu


def _round_up(x, m):
    return (x + m - 1) // m * m


def _default_vmem_budget_bytes():
    """~70% of the reported per-core VMEM (fallback: v7x's 64 MiB per TC)."""
    cap = None
    try:
        info = pltpu.get_tpu_info()
        cap = getattr(info, "vmem_capacity_bytes", None)
    except Exception:
        cap = None
    if not cap or cap <= 0:
        cap = 64 << 20
    cap = min(int(cap), 128 << 20)
    return int(cap * 0.7)


def _gcn_fused_kernel(x_ref, w_ref, b_ref, o_ref, *, relu):
    # x_ref : (TM, Kc)   matmul dtype (bf16)
    # w_ref : (Kc, TN)   matmul dtype (bf16)  -- fused conv x adjacency weight
    # b_ref : (1,  TN)   f32                  -- fused bias (+ BN shift)
    # o_ref : (TM, TN)   output dtype (bf16)
    acc = jnp.dot(x_ref[...], w_ref[...], preferred_element_type=jnp.float32)
    acc = acc + b_ref[...]
    if relu:
        acc = jnp.maximum(acc, 0.0)          # epilogue rides free VPU slots
    o_ref[...] = acc.astype(o_ref.dtype)


def fuse_gcn_params(A, weight, bias, *, kernel_size, bn_scale=None,
                    bn_shift=None, matmul_dtype=jnp.bfloat16):
    """Fold 1x1 conv + adjacency aggregation (+ optional per-channel affine,
    i.e. BatchNorm in inference form) into one (Kc_pad, C_out*V) weight and a
    (1, C_out*V) f32 bias.

    NOTE: comb is a K-term sum of conv-weight x adjacency products, so its
    dynamic range is wider than the raw weights; the bf16 cast costs ~1e-2
    relative error vs the f32 PyTorch path (fine for inference).  Pass
    matmul_dtype=jnp.float32 if exact parity matters.
    """
    K = kernel_size
    KC, C_in = weight.shape
    C_out = KC // K
    V = A.shape[-1]
    assert A.shape == (K, V, V)
    assert KC == K * C_out
    Kc = C_in * V
    Nout = C_out * V

    w_k = weight.reshape(K, C_out, C_in).astype(jnp.float32)
    A32 = A.astype(jnp.float32)
    comb = jnp.einsum('kci,kvw->ivcw', w_k, A32)          # (C_in, V, C_out, V)
    bfused = jnp.einsum('kc,kvw->cw',
                        bias.reshape(K, C_out).astype(jnp.float32), A32)

    if bn_scale is not None:
        s = bn_scale.astype(jnp.float32)[:, None]          # (C_out, 1)
        t = (jnp.zeros((C_out,), jnp.float32) if bn_shift is None
             else bn_shift.astype(jnp.float32))[:, None]
        comb = comb * s[None, None]                        # scale per channel
        bfused = bfused * s + t

    comb = comb.reshape(Kc, Nout)
    bfused = bfused.reshape(1, Nout)

    # Pad the contraction dim to a lane-dense multiple of 128 (zero rows do
    # not change the matmul); x columns must be padded the same way.
    Kc_pad = _round_up(Kc, 128)
    comb = jnp.pad(comb, ((0, Kc_pad - Kc), (0, 0)))
    return comb.astype(matmul_dtype), bfused


def gcn_matmul_flat(xm, comb, bfused, *, out_dtype=jnp.bfloat16, relu=False,
                    block_m=256, block_n=512, vmem_budget_bytes=None):
    """out[m, cw] = (relu?)(xm[m, :] @ comb[:, cw] + bfused[cw]).

    xm     : (M, Kc_pad)   matmul dtype -- flattened (n*t, c_in*v), Kc padded
    comb   : (Kc_pad, Nout) matmul dtype
    bfused : (1, Nout) f32
    Returns (M, Nout) out_dtype.  This flat layout is what chained kernelized
    layers should exchange directly (no NCTV transposes between layers).
    """
    M, Kc = xm.shape
    Kc_w, Nout = comb.shape
    assert Kc == Kc_w, (Kc, Kc_w)
    if vmem_budget_bytes is None:
        vmem_budget_bytes = _default_vmem_budget_bytes()

    in_bytes = jnp.dtype(xm.dtype).itemsize
    out_bytes = jnp.dtype(out_dtype).itemsize

    tm = min(_round_up(block_m, 128), _round_up(M, 128))
    Mp = _round_up(M, tm)
    Np128 = _round_up(Nout, 128)

    def tile_bytes(tm_, tn_):
        # Conservative: count everything double-buffered (incl. the resident
        # weight) so the plan is safe on v7x's 64 MiB per-TC VMEM.
        return 2 * (tm_ * Kc * in_bytes + Kc * tn_ * in_bytes
                    + tn_ * 4 + tm_ * tn_ * out_bytes)

    if tile_bytes(tm, Np128) <= vmem_budget_bytes:
        # ---- weight-resident path: 1-D grid over M; weight/bias block index
        # is constant, so Pallas DMAs them exactly once. ----
        tn, Np = Np128, Np128
        grid = (Mp // tm,)
        in_specs = [
            pl.BlockSpec((tm, Kc), lambda i: (i, 0)),
            pl.BlockSpec((Kc, Np), lambda i: (0, 0)),
            pl.BlockSpec((1, Np), lambda i: (0, 0)),
        ]
        out_specs = pl.BlockSpec((tm, Np), lambda i: (i, 0))
        semantics = ("parallel",)
        w_streams, x_streams = 1, 1
    else:
        # ---- streaming path: pick tn (128-multiple) that fits VMEM while
        # minimizing N-axis padding; then pick the grid order so the larger
        # streamed operand is the one fetched exactly once. ----
        best = None
        tn_cand = 128
        while tn_cand <= min(_round_up(block_n, 128), Np128):
            if tile_bytes(tm, tn_cand) <= vmem_budget_bytes:
                Np_c = _round_up(Nout, tn_cand)
                key = (Np_c, -tn_cand)          # min padding, then larger tn
                if best is None or key < best[0]:
                    best = (key, tn_cand, Np_c)
            tn_cand += 128
        if best is None:
            # last resort: shrink tm until a 128-wide weight tile fits
            while tm > 128 and tile_bytes(tm, 128) > vmem_budget_bytes:
                tm = max(_round_up(tm // 2, 128), 128)
            Mp = _round_up(M, tm)
            best = ((0, 0), 128, _round_up(Nout, 128))
        _, tn, Np = best
        gm, gn = Mp // tm, Np // tn

        w_total = Kc * Np * in_bytes
        x_total = Mp * Kc * in_bytes
        if gm * w_total <= gn * x_total:
            # M outer / N inner: x fetched once, weight streamed gm times.
            grid = (gm, gn)
            in_specs = [
                pl.BlockSpec((tm, Kc), lambda i, j: (i, 0)),
                pl.BlockSpec((Kc, tn), lambda i, j: (0, j)),
                pl.BlockSpec((1, tn), lambda i, j: (0, j)),
            ]
            out_specs = pl.BlockSpec((tm, tn), lambda i, j: (i, j))
            w_streams, x_streams = gm, 1
        else:
            # N outer / M inner: weight fetched once, x streamed gn times.
            grid = (gn, gm)
            in_specs = [
                pl.BlockSpec((tm, Kc), lambda j, i: (i, 0)),
                pl.BlockSpec((Kc, tn), lambda j, i: (0, j)),
                pl.BlockSpec((1, tn), lambda j, i: (0, j)),
            ]
            out_specs = pl.BlockSpec((tm, tn), lambda j, i: (i, j))
            w_streams, x_streams = 1, gn
        semantics = ("parallel", "parallel")

    xm_p = jnp.pad(xm, ((0, Mp - M), (0, 0)))
    comb_p = jnp.pad(comb, ((0, 0), (0, Np - Nout)))
    b_p = jnp.pad(bfused.astype(jnp.float32), ((0, 0), (0, Np - Nout)))

    cost = pl.CostEstimate(
        flops=2 * Mp * Kc * Np,
        transcendentals=0,
        bytes_accessed=(x_streams * Mp * Kc * in_bytes
                        + w_streams * Kc * Np * in_bytes
                        + Np * 4
                        + Mp * Np * out_bytes),
    )

    out_p = pl.pallas_call(
        functools.partial(_gcn_fused_kernel, relu=relu),
        out_shape=jax.ShapeDtypeStruct((Mp, Np), out_dtype),
        grid=grid,
        in_specs=in_specs,
        out_specs=out_specs,
        compiler_params=pltpu.CompilerParams(
            dimension_semantics=semantics,
            vmem_limit_bytes=int(vmem_budget_bytes)),
        cost_estimate=cost,
    )(xm_p, comb_p, b_p)

    # NOTE: padded rows/cols of out_p are not zero (they carry the fused
    # bias); never use out_p unsliced.
    return out_p[:M, :Nout]


def conv_temporal_graphical(x, A, weight, bias, *, kernel_size,
                            bn_scale=None, bn_shift=None, relu=False,
                            out_dtype=jnp.bfloat16, matmul_dtype=jnp.bfloat16,
                            block_m=256, block_n=512, vmem_budget_bytes=None):
    """ConvTemporalGraphical.forward (t_kernel_size=1, stride=1, padding=0),
    optionally with the BN affine + ReLU that open st_gcn_block.tcn fused in.

    Returns (out, A) with out: (N, C_out, T, V), matching the PyTorch module.

    NOTE: this NCTV convenience wrapper pays one boundary relayout on each
    side; when chaining kernelized layers keep activations in the flat
    (N*T, C*V) bf16 layout and call gcn_matmul_flat directly.
    """
    N, C_in, T, V = x.shape
    K = kernel_size
    assert A.shape == (K, V, V)
    # Only the 1x1-conv configuration (the STGCN_UCLA default) is supported.
    assert weight.ndim == 2 and weight.shape[1] == C_in, (
        "only t_kernel_size=1, t_stride=1, t_padding=0 is implemented")
    C_out = weight.shape[0] // K
    Kc = C_in * V
    Kc_pad = _round_up(Kc, 128)

    comb, bfused = fuse_gcn_params(A, weight, bias, kernel_size=K,
                                   bn_scale=bn_scale, bn_shift=bn_shift,
                                   matmul_dtype=matmul_dtype)

    M = N * T
    xm = jnp.transpose(x, (0, 2, 1, 3)).reshape(M, Kc)
    xm = jnp.pad(xm, ((0, 0), (0, Kc_pad - Kc))).astype(matmul_dtype)

    out = gcn_matmul_flat(xm, comb, bfused, out_dtype=out_dtype, relu=relu,
                          block_m=block_m, block_n=block_n,
                          vmem_budget_bytes=vmem_budget_bytes)

    out = out.reshape(N, T, C_out, V)
    out = jnp.transpose(out, (0, 2, 1, 3))
    return out, A


def _reference_gcn(x, A, weight, bias, kernel_size):
    # pure-JAX f32 reference of the PyTorch forward (1x1 conv + einsum)
    N, C_in, T, V = x.shape
    K = kernel_size
    C_out = weight.shape[0] // K
    y = jnp.einsum('nctv,oc->notv', x, weight) + bias[None, :, None, None]
    y = y.reshape(N, K, C_out, T, V)
    return jnp.einsum('nkctv,kvw->nctw', y, A)


if __name__ == "__main__":
    # Shapes consistent with the UCLA model: V=19 joints, K=3 spatial kernel
    # ('distance' partitioning, max_hop=2).  Channels/time kept small so the
    # script runs instantly; M = N*T = 512 gives 2 grid steps along M.
    N, C_in, C_out, T, V, K = 2, 3, 16, 256, 19, 3

    key = jax.random.PRNGKey(0)
    kx, ka, kw, kb, kg, kbt = jax.random.split(key, 6)

    x = jax.random.normal(kx, (N, C_in, T, V), dtype=jnp.float32)
    A = jax.random.normal(ka, (K, V, V), dtype=jnp.float32)
    # deterministic "Conv2d(C_in, K*C_out, (1,1))" parameters
    weight = jax.random.normal(kw, (K * C_out, C_in), dtype=jnp.float32) * 0.1
    bias = jax.random.normal(kb, (K * C_out,), dtype=jnp.float32) * 0.1

    # ---- plain ConvTemporalGraphical semantics (bf16 matmul / bf16 out) ----
    out, A_out = conv_temporal_graphical(x, A, weight, bias, kernel_size=K)
    out = jax.block_until_ready(out)
    ref = _reference_gcn(x, A, weight, bias, K)
    assert out.shape == (N, C_out, T, V)
    err = float(jnp.max(jnp.abs(out.astype(jnp.float32) - ref)))
    scale = float(jnp.max(jnp.abs(ref))) + 1e-6
    assert err / scale < 5e-2, (err, scale)

    # ---- fused BatchNorm-affine (inference form) + ReLU epilogue ----
    gamma = 1.0 + 0.1 * jax.random.normal(kg, (C_out,), dtype=jnp.float32)
    beta = 0.1 * jax.random.normal(kbt, (C_out,), dtype=jnp.float32)
    out2, _ = conv_temporal_graphical(x, A, weight, bias, kernel_size=K,
                                      bn_scale=gamma, bn_shift=beta, relu=True)
    out2 = jax.block_until_ready(out2)
    ref2 = jnp.maximum(gamma[None, :, None, None] * ref
                       + beta[None, :, None, None], 0.0)
    err2 = float(jnp.max(jnp.abs(out2.astype(jnp.float32) - ref2)))
    scale2 = float(jnp.max(jnp.abs(ref2))) + 1e-6
    assert err2 / scale2 < 5e-2, (err2, scale2)

    print("KERNEL_OK")
</pallas_src>

<mosaic_0001>
module attributes {stable_mosaic.version = 11 : i64} {
  func.func @_gcn_fused_kernel(%arg0: i32, %arg1: memref<256x128xbf16, #tpu.memory_space<vmem>>, %arg2: memref<128x384xbf16, #tpu.memory_space<vmem>>, %arg3: memref<1x384xf32, #tpu.memory_space<vmem>>, %arg4: memref<256x384xbf16, #tpu.memory_space<vmem>>) attributes {dimension_semantics = [#tpu.dimension_semantics<parallel>], iteration_bounds = array<i64: 2>, scalar_prefetch = 0 : i64, scratch_operands = 0 : i64, tpu.core_type = #tpu.core_type<tc>, window_params = [{transform_indices = @transform_0, window_bounds = array<i64: 256, 128>}, {pipeline_mode = #tpu.pipeline_mode<synchronous>, transform_indices = @transform_1, window_bounds = array<i64: 128, 384>}, {pipeline_mode = #tpu.pipeline_mode<synchronous>, transform_indices = @transform_2, window_bounds = array<i64: 1, 384>}, {transform_indices = @transform_3, window_bounds = array<i64: 256, 384>}]} {
    %c0 = arith.constant 0 : index
    %c0_0 = arith.constant 0 : index
    %0 = vector.load %arg1[%c0, %c0_0] : memref<256x128xbf16, #tpu.memory_space<vmem>>, vector<256x128xbf16>
    %c0_1 = arith.constant 0 : index
    %c0_2 = arith.constant 0 : index
    %1 = vector.load %arg2[%c0_1, %c0_2] : memref<128x384xbf16, #tpu.memory_space<vmem>>, vector<128x384xbf16>
    %cst = arith.constant dense<0.000000e+00> : vector<256x384xf32>
    %2 = tpu.matmul %0, %1, %cst {dimension_numbers = #tpu.dot_dimension_numbers<[1], [0], [0], [1], [0, 0, 1, 1], [], []>} : vector<256x128xbf16>, vector<128x384xbf16>, vector<256x384xf32> -> vector<256x384xf32>
    %c0_3 = arith.constant 0 : index
    %c0_4 = arith.constant 0 : index
    %3 = vector.load %arg3[%c0_3, %c0_4] : memref<1x384xf32, #tpu.memory_space<vmem>>, vector<1x384xf32>
    %4 = vector.broadcast %3 : vector<1x384xf32> to vector<256x384xf32>
    %5 = arith.addf %2, %4 : vector<256x384xf32>
    %6 = arith.truncf %5 : vector<256x384xf32> to vector<256x384xbf16>
    %c0_5 = arith.constant 0 : index
    %c0_6 = arith.constant 0 : index
    %7 = vector.load %arg4[%c0_5, %c0_6] : memref<256x384xbf16, #tpu.memory_space<vmem>>, vector<256x384xbf16>
    tpu.vector_store %arg4[%c0_5, %c0_6], %6 {strides = array<i32>} : memref<256x384xbf16, #tpu.memory_space<vmem>>, vector<256x384xbf16>,
    return
  }
  func.func @transform_0(%arg0: i32) -> (i32, i32) {
    %c0_i32 = arith.constant 0 : i32
    %c0_i32_0 = arith.constant 0 : i32
    return %arg0, %c0_i32 : i32, i32
  }
  func.func @transform_1(%arg0: i32) -> (i32, i32) {
    %c0_i32 = arith.constant 0 : i32
    %c0_i32_0 = arith.constant 0 : i32
    %c0_i32_1 = arith.constant 0 : i32
    return %c0_i32, %c0_i32_0 : i32, i32
  }
  func.func @transform_2(%arg0: i32) -> (i32, i32) {
    %c0_i32 = arith.constant 0 : i32
    %c0_i32_0 = arith.constant 0 : i32
    %c0_i32_1 = arith.constant 0 : i32
    return %c0_i32, %c0_i32_0 : i32, i32
  }
  func.func @transform_3(%arg0: i32) -> (i32, i32) {
    %c0_i32 = arith.constant 0 : i32
    %c0_i32_0 = arith.constant 0 : i32
    return %arg0, %c0_i32 : i32, i32
  }
}

</mosaic_0001>

<bundles_post_ra>
// kernel: tpu_custom_call.1
= control target key start
LH: loop header
LB: loop body
LE: loop exit
PB: predicated region body
PF: predicated region fallthrough
CT: control target
= control target key end

     0   :  { %8 = vsyncpa [#allocation3], 0  ;;  %s2320_s0 = inlined_call_operand.hbm [shape: bf16[512,128], index: 0, kind: input, shape index: {}]   ;;  %s2321_s1 = inlined_call_operand.hbm [shape: bf16[128,384], index: 1, kind: input, shape index: {}]   ;;  %s2322_s2 = inlined_call_operand.vmem [shape: f32[1,384], index: 2, kind: input, shape index: {}]   ;;  %s2323_s3 = inlined_call_operand.hbm [shape: bf16[512,384], index: 3, kind: output, shape index: {}]  }
   0x1   :  { %10 = vsyncpa [#allocation3 + $0x1], 0 }
   0x2   :  { %11 = vsyncpa [#allocation6], 0 }
   0x3   :  { %12 = vsyncpa [#allocation4], 0 }
   0x4   :  { %14 = vsyncpa [#allocation4 + $0x1], 0  ;;  %s1894_s12 = smov 0   ;;  %s1896_s13 = smov 0  }
   0x5   :  { %s1898_s14 = smov 0   ;;  %s1900_s15 = smov 0  }
   0x6 LB: > { %s1915_s16 = sadd.s32 4294967295, %s1862_s15   ;;  %s1348_s17 = sadd.s32 4294967294, %s1862_s15   ;;  %s1862_s15 = sphi %s1900_s15, %s2343_s15   ;;  %s1858_s14 = sphi %s1898_s14, %s2342_s14   ;;  %s1854_s13 = sphi %s1896_s13, %s2341_s13   ;;  %s1850_s12 = sphi %s1894_s12, %s2340_s12  }
   0x7   : > { %p40_p0 = scmp.ne.s32.totalorder %s1854_s13, %s1850_s12  ;;  %p2324_p1 = scmp.eq.s32.totalorder %s1915_s16, 0 }
   0x8   : > { %p112_p3 = scmp.eq.s32.totalorder %s1348_s17, 1  ;;  %p1349_p5 = scmp.ge.s32.totalorder %s1862_s15, 1 }
   0x9   : > { %p1924_p4 = por %p2324_p1, %p40_p0  ;;  %p119_p7 = scmp.lt.s32.totalorder %s1862_s15, 3 }
   0xa   : > { %p1929_p6 = por %p112_p3, %p40_p0  ;;  %s1864_s21 = smov [#allocation5]  }
   0xb   : > { %s2327_s18 = scalar_select %p1924_p4, 1, 0 }
   0xc   : > { %s2328_s19 = scalar_select %p1929_p6, 1, 0 }
   0xd   : > { %p1934_p8 = pnand %p1349_p5, %p119_p7  ;;  %s131_s22 = sshll.u32 %s1864_s21, 4  ;;  %s1938_s22 = int_to_ptr.vmem [resolvable:$true] %s131_s22 }
   0xe   : > { %s1950_s24 = sadd.s32 1, %s1862_s15   ;;  %s27_s25 = sadd.s32 1, %s1858_s14 }
   0xf   : > { %s2329_s20 = scalar_select %p1934_p8, 1, 0 }
  0x10   : > { %p1630_p9 = pneg %p1934_p8  ;;  %s24_s26 = ssub.s32 %s1862_s15, %s1950_s24 }
  0x11   : > { %s1734_s29 = scalar_lea.hbm %s2321_s1, 3072 }
  0x12   : > { %p1945_p11 = pnand %p1630_p9, %p2324_p1  ;;  %p1735_p12 = scmp.ne.s32.totalorder %s2321_s1, %s1734_s29 }
  0x13   : > { %p1741_p5 = scmp.lt.u32.totalorder %s1734_s29, %s2321_s1 }
  0x14   : > { %p1736_p13 = pneg %p1945_p11 }
  0x16   : > { %p1737_p0 = pnand %p1736_p13, %p1735_p12 }
  0x18   : > { %p1738_p3 = pneg %p1737_p0 }
  0x1a   : > { %p1743_p7 = pnand %p1741_p5, %p1738_p3 }
  0x1c   : > { %1746 = shalt.err (!%p1743_p7)
}
  0x1d   : > { %s1747_s7 = scalar_lea.vmem %s1938_s22, 3072  ;;  %p1755_p2 = scmp.lt.s32.totalorder %s1938_s22, %s1938_s22 }
  0x1e   : > { %p1748_p9 = scmp.ne.s32.totalorder %s1938_s22, %s1747_s7  ;;  %p1756_p6 = scmp.lt.s32.totalorder %s1747_s7, %s1747_s7 }
  0x20   : > { %p1750_p10 = pnand %p1748_p9, %p1736_p13  ;;  %p1757_p4 = por %p1756_p6, %p1755_p2 }
  0x22   : > { %p1751_p1 = pneg %p1750_p10 }
  0x24   : > { %p1758_p8 = pnand %p1757_p4, %p1751_p1 }
  0x26   : > { %1761 = shalt.err (!%p1758_p8)
}
  0x27   : > { %s1865_s8 = smov 192   ;;  %s1866_s9 = smov 12  }
  0x28   : > { %1633 = dma.hbm_to_vmem [thread:$0]  (!%p1945_p11), %s2321_s1, 3072, %s1938_s22, [#allocation6], %s1865_s8, %s1865_s8, %s1866_s9  }
  0x29   : > { %p25_p2 = scmp.eq.s32.totalorder %s24_s26, 0  ;;  %p34_p1 = scmp.ne.s32.totalorder %s1858_s14, %s1854_s13 }
  0x2a   : > { %p35_p4 = scmp.eq.s32.totalorder %s1862_s15, 0  ;;  %p1643_p6 = scmp.lt.s32.totalorder %s1862_s15, 2 }
  0x2b   : > { %s1981_s17 = scalar_select %p25_p2, %s1858_s14, %s27_s25  }
  0x2c   : > { %p36_p8 = por %p35_p4, %p34_p1  ;;  %p2331_p10 = scmp.eq.s32.totalorder %s1915_s16, 1 }
  0x2d   : > { %s148_s27 = sand.u32 1, %s1858_s14   ;;  %s1467_s28 = sshll.u32 %s1862_s15, 11 }
  0x2e   : > { %p1985_p12 = por %p2331_p10, %p34_p1  ;;  %s1352_s29 = sshll.u32 %s148_s27, 7 }
  0x2f   : > { %s1994_s4 = scalar_lea.hbm %s2320_s0, %s1467_s28  ;;  %s152_s22 = scalar_lea.vmem [#allocation2], %s1352_s29 }
  0x30   : > { %s159_s25 = sshll.u32 %s152_s22, 4  ;;  %p1996_p11 = pnand %p1643_p6, %p36_p8  ;;  %s2000_s25 = int_to_ptr.vmem [resolvable:$true] %s159_s25 }
  0x31   : > { %s2002_s5 = scalar_lea.sflag [#allocation3], %s148_s27  ;;  %s1762_s6 = scalar_lea.hbm %s1994_s4, 2048 }
  0x32   : > { %p1763_p13 = scmp.ne.s32.totalorder %s1994_s4, %s1762_s6  ;;  %p1764_p0 = pneg %p1996_p11 }
  0x33   : > { %s1767_s9 = scalar_lea.hbm %s2320_s0, 4096  ;;  %p1768_p7 = scmp.lt.u32.totalorder %s1994_s4, %s2320_s0 }
  0x34   : > { %p1765_p3 = pnand %p1764_p0, %p1763_p13  ;;  %p1769_p9 = scmp.lt.u32.totalorder %s1767_s9, %s1762_s6 }
  0x35   : > { %p1771_p1 = scmp.lt.u32.totalorder %s1762_s6, %s1994_s4 }
  0x36   : > { %p1766_p5 = pneg %p1765_p3  ;;  %p1770_p2 = por %p1769_p9, %p1768_p7 }
  0x38   : > { %p1772_p4 = por %p1771_p1, %p1770_p2 }
  0x3a   : > { %p1773_p6 = pnand %p1772_p4, %p1766_p5 }
  0x3c   : > { %1776 = shalt.err (!%p1773_p6)
}
  0x3d   : > { %s1777_s27 = scalar_lea.vmem %s2000_s25, 2048  ;;  %s1867_s28 = smov [#allocation2]  }
  0x3e   : > { %p1778_p8 = scmp.ne.s32.totalorder %s2000_s25, %s1777_s27  ;;  %s1782_s29 = sshll.u32 %s1867_s28, 4  ;;  %s1783_s29 = int_to_ptr.vmem [resolvable:$false] %s1782_s29 }
  0x3f   : > { %s1784_s23 = scalar_lea.vmem %s1783_s29, 4096  ;;  %p1785_p3 = scmp.lt.s32.totalorder %s2000_s25, %s1783_s29 }
  0x40   : > { %p1780_p10 = pnand %p1778_p8, %p1764_p0  ;;  %p1786_p7 = scmp.lt.s32.totalorder %s1784_s23, %s1777_s27 }
  0x42   : > { %p1781_p13 = pneg %p1780_p10  ;;  %p1787_p9 = por %p1786_p7, %p1785_p3 }
  0x44   : > { %p1788_p2 = pnand %p1787_p9, %p1781_p13 }
  0x46   : > { %1791 = shalt.err (!%p1788_p2)
}
  0x47   : > { %s1868_s30 = smov 64   ;;  %s1869_s22 = smov 4  }
  0x48   : > { %1637 = dma.hbm_to_vmem [thread:$0]  (!%p1996_p11), %s1994_s4, 2048, %s2000_s25, %s2002_s5, %s1868_s30, %s1868_s30, %s1869_s22  }
  0x49   : > { %p2334_p0 = scmp.ne.s32.totalorder %s2329_s20, 0 }
  0x4a   : > { %s2033_s6 = sand.u32 (!%p2334_p0), 1, %s1854_s13   ;;  %p2335_p5 = scmp.ne.s32.totalorder (!%p2334_p0), %s2327_s18, 0 }
  0x4b   : > { %171 = sbr.rel (%p2334_p0) target bundleno = 442 (0x1ba), region = 32  ;;  %s1356_s7 = sshll.u32 (!%p2334_p0), %s2033_s6, 7 }
  0x4c   : > { %s174_s8 = scalar_lea.sflag (!%p2334_p0), [#allocation3], %s2033_s6  ;;  %s2037_s9 = scalar_lea.vmem (!%p2334_p0), [#allocation2], %s1356_s7 }
  0x52   : > { %1837 = dma.done.wait (%p2335_p5), %s174_s8, 2048  }
  0x53   : > { %1839 = vsyncadd (%p2335_p5), %s174_s8, 4294965248  ;;  %p2336_p11 = scmp.eq.s32.totalorder %s1915_s16, 0 }
  0x55   : > { %1841 = dma.done.wait (%p2336_p11), [#allocation6], 3072   ;;  %p2337_p1 = pmov %p2336_p11 }
  0x56   : > { %v1870_v0 = vmov 0   ;;  %v1686_v1 = vld [vmem:[#allocation5 + $0x4] ss:$12 sps:$4 sm:$0xff]   ;;  %v1688_v2 = vld [vmem:[#allocation5] ss:$12 sps:$4 sm:$0xff]   ;;  %v1722_v30 = vld [vmem:[%s2037_s9 + $0x18] sm:$0xff]   ;;  %v273_v41 = vlaneseq }
  0x57   : > { %1843 = vsyncadd (%p2337_p1), [#allocation6], 4294964224  ;;  %544 = vmatprep.mubr.bf16.mxu0 %v1870_v0  ;;  %664 = vmatprep.mubr.bf16.mxu1 %v1870_v0  ;;  %v1689_v3 = vld [vmem:[#allocation5 + $0x1c] ss:$12 sps:$4 sm:$0xff]   ;;  %v1691_v4 = vld [vmem:[#allocation5 + $0x18] ss:$12 sps:$4 sm:$0xff]  }
  0x58   : > { %512 = vmatprep.subr.bf16.mxu0 %v1686_v1  ;;  %1604 = vmatprep.subr.bf16.mxu1 %v1686_v1  ;;  %v1692_v5 = vld [vmem:[#allocation5 + $0x34] ss:$12 sps:$4 sm:$0xff]   ;;  %v1694_v6 = vld [vmem:[#allocation5 + $0x30] ss:$12 sps:$4 sm:$0xff]   ;;  %v1695_v7 = vld [vmem:[#allocation5 + $0x4c] ss:$12 sps:$4 sm:$0xff]  }
  0x59   : > { %513 = vmatpush1.bf16.msra.mxu0 %v1688_v2  ;;  %1612 = vmatpush1.bf16.msra.mxu1 %v1688_v2  ;;  %v1697_v8 = vld [vmem:[#allocation5 + $0x48] ss:$12 sps:$4 sm:$0xff]   ;;  %v1698_v9 = vld [vmem:[#allocation5 + $0x64] ss:$12 sps:$4 sm:$0xff]   ;;  %v1700_v10 = vld [vmem:[#allocation5 + $0x60] ss:$12 sps:$4 sm:$0xff]  }
  0x5a   : > { %514 = vmatprep.subr.bf16.mxu0 %v1689_v3  ;;  %1605 = vmatprep.subr.bf16.mxu1 %v1689_v3  ;;  %v1701_v11 = vld [vmem:[#allocation5 + $0x7c] ss:$12 sps:$4 sm:$0xff]   ;;  %v1703_v12 = vld [vmem:[#allocation5 + $0x78] ss:$12 sps:$4 sm:$0xff]   ;;  %v1704_v13 = vld [vmem:[#allocation5 + $0x94] ss:$12 sps:$4 sm:$0xff]  }
  0x5b   : > { %v1706_v14 = vld [vmem:[#allocation5 + $0x90] ss:$12 sps:$4 sm:$0xff]   ;;  %v1707_v15 = vld [vmem:[#allocation5 + $0xac] ss:$12 sps:$4 sm:$0xff]   ;;  %v1709_v16 = vld [vmem:[#allocation5 + $0xa8] ss:$12 sps:$4 sm:$0xff]  }
  0x5c   : > { %v1712_v17 = vld [vmem:[#allocation5 + $0x8] ss:$12 sps:$4 sm:$0xff]   ;;  %v1710_v18 = vld [vmem:[%s2037_s9] sm:$0xff]   ;;  %v1717_v24 = vld [vmem:[#allocation5 + $0x50] ss:$12 sps:$4 sm:$0xff]   ;;  %v2087_v42 = vshrl.u32 %v273_v41, 7 }
  0x5d   : > { %515 = vmatpush1.bf16.msra.mxu0 %v1691_v4  ;;  %1613 = vmatpush1.bf16.msra.mxu1 %v1691_v4  ;;  %v2051_v19 = vld [vmem:[%s2037_s9 + $0x60] sm:$0xff]   ;;  %v1714_v22 = vld [vmem:[%s2037_s9 + $0x8] sm:$0xff]   ;;  %v1718_v26 = vld [vmem:[%s2037_s9 + $0x10] sm:$0xff]   ;;  %s1620_s4 = smul.u32 384, %s2033_s6  ;;  %s1251_s27 = scalar_lea.sflag [#allocation4], %s2033_s6 }
  0x5e   : > { %516 = vmatprep.subr.bf16.mxu0 %v1692_v5  ;;  %1606 = vmatprep.subr.bf16.mxu1 %v1692_v5  ;;  %v1713_v20 = vld [vmem:[#allocation5 + $0x20] ss:$12 sps:$4 sm:$0xff]   ;;  %v1716_v21 = vld [vmem:[#allocation5 + $0x38] ss:$12 sps:$4 sm:$0xff]   ;;  %v1720_v25 = vld [vmem:[#allocation5 + $0x68] ss:$12 sps:$4 sm:$0xff]  }
  0x5f   : > { %v2058_v23 = vld [vmem:[%s2037_s9 + $0x68] sm:$0xff]   ;;  %v1719_v27 = vld [vmem:[%s2037_s9 + $0x70] sm:$0xff]   ;;  %v1724_v29 = vld [vmem:[#allocation5 + $0x98] ss:$12 sps:$4 sm:$0xff]   ;;  %v275_v43 = vsub.s32 0, %v2087_v42  ;;  %v279_v45 = vsub.s32 1, %v2087_v42 }
  0x60   : > { %v1721_v28 = vld [vmem:[#allocation5 + $0x80] ss:$12 sps:$4 sm:$0xff]   ;;  %v1723_v31 = vld [vmem:[%s2037_s9 + $0x78] sm:$0xff]   ;;  %v1728_v35 = vld [vmem:[%s2037_s9 + $0x30] sm:$0xff]   ;;  %s2111_s25 = scalar_lea.vmem [#allocation7], %s1620_s4  ;;  %s1621_s26 = smul.u32 6144, %s1915_s16 }
  0x61   : > { %517 = vmatpush1.bf16.msra.mxu0 %v1694_v6  ;;  %1614 = vmatpush1.bf16.msra.mxu1 %v1694_v6  ;;  %v1725_v32 = vld [vmem:[#allocation5 + $0xb0] ss:$12 sps:$4 sm:$0xff]   ;;  %v1726_v33 = vld [vmem:[%s2037_s9 + $0x20] sm:$0xff]   ;;  %v1727_v34 = vld [vmem:[%s2037_s9 + $0x28] sm:$0xff]   ;;  %s1265_s5 = sshll.u32 %s2111_s25, 4  ;;  %s1871_s29 = smov [#allocation7]   ;;  %s2271_s5 = int_to_ptr.vmem [resolvable:$true] %s1265_s5 }
  0x62   : > { %518 = vmatprep.subr.bf16.mxu0 %v1695_v7  ;;  %1607 = vmatprep.subr.bf16.mxu1 %v1695_v7  ;;  %v1729_v36 = vld [vmem:[%s2037_s9 + $0x38] sm:$0xff]   ;;  %v1730_v37 = vld [vmem:[%s2037_s9 + $0x40] sm:$0xff]   ;;  %v1731_v38 = vld [vmem:[%s2037_s9 + $0x48] sm:$0xff]   ;;  %s2269_s11 = scalar_lea.hbm %s2323_s3, %s1621_s26  ;;  %s1792_s28 = scalar_lea.vmem %s2271_s5, 6144 }
  0x63   : > { %v1732_v39 = vld [vmem:[%s2037_s9 + $0x50] sm:$0xff]   ;;  %v1733_v40 = vld [vmem:[%s2037_s9 + $0x58] sm:$0xff]   ;;  %v2093_v44 = vld [vmem:[%s2322_s2] sm:$0x7]  ;;  %p1793_p4 = scmp.ne.s32.totalorder %s2271_s5, %s1792_s28  ;;  %s1796_s23 = sshll.u32 %s1871_s29, 4  ;;  %s1797_s23 = int_to_ptr.vmem [resolvable:$false] %s1796_s23 }
  0x64   : > { %v2097_v46 = vrot.slane %v2093_v44, %v275_v43  ;;  %v2100_v47 = vrot.slane %v2093_v44, %v279_v45  ;;  %s1798_s30 = scalar_lea.vmem %s1797_s23, 12288  ;;  %p1799_p10 = scmp.lt.s32.totalorder %s2271_s5, %s1797_s23 }
  0x65   : > { %519 = vmatpush1.bf16.msra.mxu0 %v1697_v8  ;;  %1615 = vmatpush1.bf16.msra.mxu1 %v1697_v8  ;;  %p1794_p6 = pnand %p1793_p4, %p1985_p12  ;;  %p1800_p13 = scmp.lt.s32.totalorder %s1798_s30, %s1792_s28 }
  0x66   : > { %520 = vmatprep.subr.bf16.mxu0 %v1698_v9  ;;  %1608 = vmatprep.subr.bf16.mxu1 %v1698_v9 }
  0x67   : > { %p1795_p8 = pneg %p1794_p6  ;;  %p1801_p3 = por %p1800_p13, %p1799_p10 }
  0x69   : > { %521 = vmatpush1.bf16.msra.mxu0 %v1700_v10  ;;  %1616 = vmatpush1.bf16.msra.mxu1 %v1700_v10  ;;  %p1802_p7 = pnand %p1801_p3, %p1795_p8 }
  0x6a   : > { %522 = vmatprep.subr.bf16.mxu0 %v1701_v11  ;;  %1609 = vmatprep.subr.bf16.mxu1 %v1701_v11 }
  0x6d   : > { %523 = vmatpush1.bf16.msra.mxu0 %v1703_v12  ;;  %1617 = vmatpush1.bf16.msra.mxu1 %v1703_v12 }
  0x6e   : > { %524 = vmatprep.subr.bf16.mxu0 %v1704_v13  ;;  %1610 = vmatprep.subr.bf16.mxu1 %v1704_v13 }
  0x71   : > { %525 = vmatpush1.bf16.msra.mxu0 %v1706_v14  ;;  %1618 = vmatpush1.bf16.msra.mxu1 %v1706_v14 }
  0x72   : > { %526 = vmatprep.subr.bf16.mxu0 %v1707_v15  ;;  %1611 = vmatprep.subr.bf16.mxu1 %v1707_v15 }
  0x75   : > { %527 = vmatpush1.bf16.msra.mxu0 %v1709_v16  ;;  %1619 = vmatpush1.bf16.msra.mxu1 %v1709_v16 }
  0x76   : > { %1556 = vmatprep.subr.bf16.mxu1 %v1712_v17 }
  0x78   : > { %545 = vmatmul.mubr.bf16.vlgmr.msra.gmra.mrb[0].mxu0 %v1710_v18  ;;  %665 = vmatmul.mubr.bf16.vlgmr.msra.gmra.mrb[0].mxu1 %v2051_v19 }
  0x79   : > { %1557 = vmatpush3.bf16.msra.mxu1 %v1712_v17  ;;  %554 = vmatprep.mubr.bf16.mxu0 %v1870_v0 }
  0x7a   : > { %1558 = vmatprep.subr.bf16.mxu1 %v1713_v20  ;;  %674 = vmatprep.mubr.bf16.mxu1 %v1870_v0 }
  0x7d   : > { %1559 = vmatpush3.bf16.msra.mxu1 %v1713_v20 }
  0x7e   : > { %1560 = vmatprep.subr.bf16.mxu1 %v1716_v21 }
  0x80   : > { %555 = vmatmul.mubr.bf16.gmra.mrb[4].mxu0 %v1714_v22  ;;  %675 = vmatmul.mubr.bf16.gmra.mrb[4].mxu1 %v2058_v23 }
  0x81   : > { %1561 = vmatpush3.bf16.msra.mxu1 %v1716_v21  ;;  %564 = vmatprep.mubr.bf16.mxu0 %v1870_v0 }
  0x82   : > { %1562 = vmatprep.subr.bf16.mxu1 %v1717_v24  ;;  %684 = vmatprep.mubr.bf16.mxu1 %v1870_v0 }
  0x85   : > { %1563 = vmatpush3.bf16.msra.mxu1 %v1717_v24 }
  0x86   : > { %1564 = vmatprep.subr.bf16.mxu1 %v1720_v25 }
  0x88   : > { %565 = vmatmul.mubr.bf16.gmra.mrb[8].mxu0 %v1718_v26  ;;  %685 = vmatmul.mubr.bf16.gmra.mrb[8].mxu1 %v1719_v27 }
  0x89   : > { %1565 = vmatpush3.bf16.msra.mxu1 %v1720_v25  ;;  %574 = vmatprep.mubr.bf16.mxu0 %v1870_v0 }
  0x8a   : > { %1566 = vmatprep.subr.bf16.mxu1 %v1721_v28  ;;  %694 = vmatprep.mubr.bf16.mxu1 %v1870_v0 }
  0x8d   : > { %1567 = vmatpush3.bf16.msra.mxu1 %v1721_v28 }
  0x8e   : > { %1568 = vmatprep.subr.bf16.mxu1 %v1724_v29 }
  0x90   : > { %575 = vmatmul.mubr.bf16.gmra.mrb[12].mxu0 %v1722_v30  ;;  %695 = vmatmul.mubr.bf16.gmra.mrb[12].mxu1 %v1723_v31 }
  0x91   : > { %1569 = vmatpush3.bf16.msra.mxu1 %v1724_v29  ;;  %584 = vmatprep.mubr.bf16.mxu0 %v1870_v0 }
  0x92   : > { %1570 = vmatprep.subr.bf16.mxu1 %v1725_v32  ;;  %1572 = vmatprep.mubr.bf16.mxu1 %v1710_v18 }
  0x95   : > { %1571 = vmatpush3.bf16.msra.mxu1 %v1725_v32 }
  0x98   : > { %585 = vmatmul.mubr.bf16.gmra.mrb[16].mxu0 %v1726_v33  ;;  %1573 = vmatmul.mubr.bf16.vlgmr.msra.gmra.mrb[16].mxu1 %v1714_v22 }
  0x99   : > { %594 = vmatprep.mubr.bf16.mxu0 %v1870_v0  ;;  %1576 = vmatprep.mubr.bf16.mxu1 %v1718_v26 }
  0xa0   : > { %595 = vmatmul.mubr.bf16.gmra.mrb[20].mxu0 %v1727_v34  ;;  %1577 = vmatmul.mubr.bf16.gmra.mrb[20].mxu1 %v1722_v30 }
  0xa1   : > { %604 = vmatprep.mubr.bf16.mxu0 %v1870_v0  ;;  %1580 = vmatprep.mubr.bf16.mxu1 %v1726_v33 }
  0xa8   : > { %605 = vmatmul.mubr.bf16.gmra.mrb[24].mxu0 %v1728_v35  ;;  %1581 = vmatmul.mubr.bf16.gmra.mrb[24].mxu1 %v1727_v34 }
  0xa9   : > { %614 = vmatprep.mubr.bf16.mxu0 %v1870_v0  ;;  %1584 = vmatprep.mubr.bf16.mxu1 %v1728_v35 }
  0xb0   : > { %615 = vmatmul.mubr.bf16.gmra.mrb[28].mxu0 %v1729_v36  ;;  %1585 = vmatmul.mubr.bf16.gmra.mrb[28].mxu1 %v1729_v36 }
  0xb1   : > { %624 = vmatprep.mubr.bf16.mxu0 %v1870_v0  ;;  %1588 = vmatprep.mubr.bf16.mxu1 %v1730_v37 }
  0xb8   : > { %625 = vmatmul.mubr.bf16.gmra.mrb[32].mxu0 %v1730_v37  ;;  %1589 = vmatmul.mubr.bf16.gmra.mrb[32].mxu1 %v1731_v38 }
  0xb9   : > { %634 = vmatprep.mubr.bf16.mxu0 %v1870_v0  ;;  %1592 = vmatprep.mubr.bf16.mxu1 %v1732_v39 }
  0xc0   : > { %635 = vmatmul.mubr.bf16.gmra.mrb[36].mxu0 %v1731_v38  ;;  %1593 = vmatmul.mubr.bf16.gmra.mrb[36].mxu1 %v1733_v40 }
  0xc1   : > { %644 = vmatprep.mubr.bf16.mxu0 %v1870_v0  ;;  %1596 = vmatprep.mubr.bf16.mxu1 %v2051_v19 }
  0xc8   : > { %645 = vmatmul.mubr.bf16.gmra.mrb[40].mxu0 %v1732_v39  ;;  %1597 = vmatmul.mubr.bf16.gmra.mrb[40].mxu1 %v2058_v23 }
  0xc9   : > { %654 = vmatprep.mubr.bf16.mxu0 %v1870_v0  ;;  %1600 = vmatprep.mubr.bf16.mxu1 %v1719_v27 }
  0xd0   : > { %655 = vmatmul.mubr.bf16.gmra.mrb[44].mxu0 %v1733_v40  ;;  %1601 = vmatmul.mubr.bf16.gmra.mrb[44].mxu1 %v1723_v31 }
 0x14b   : > { %v546_v48 = vpop.f32.mrb[0].mxu0  ;;  %v666_v49 = vpop.f32.mrb[0].mxu1 }
 0x14c   : > { %v547_v50 = vadd.f32 %v546_v48, %v2097_v46  ;;  %v667_v51 = vadd.f32 %v666_v49, %v2097_v46  ;;  %v548_v52 = vpop.f32.mrb[1].mxu0  ;;  %v668_v53 = vpop.f32.mrb[1].mxu1 }
 0x14d   : > { %v549_v54 = vadd.f32 %v548_v52, %v2100_v47  ;;  %v669_v55 = vadd.f32 %v668_v53, %v2100_v47  ;;  %v550_v56 = vpop.f32.mrb[2].mxu0  ;;  %v670_v57 = vpop.f32.mrb[2].mxu1 }
 0x14e   : > { %v551_v58 = vadd.f32 %v550_v56, %v2097_v46  ;;  %v671_v59 = vadd.f32 %v670_v57, %v2097_v46  ;;  %v552_v60 = vpop.f32.mrb[3].mxu0  ;;  %v672_v61 = vpop.f32.mrb[3].mxu1 }
 0x14f   : > { %v1468_v62 = vpack.c.bf16 %v549_v54, %v547_v50  ;;  %v1516_v63 = vpack.c.bf16 %v669_v55, %v667_v51  ;;  %v553_v0 = vadd.f32 %v552_v60, %v2100_v47  ;;  %v673_v1 = vadd.f32 %v672_v61, %v2100_v47 }
 0x150   : > { %v283_v54 = vsub.s32 2, %v2087_v42 }
 0x151   : > { %1186 = vst [vmem:[%s2111_s25] sm:$0xff] %v1468_v62  ;;  %1234 = vst [vmem:[%s2111_s25 + $0x120] sm:$0xff] %v1516_v63  ;;  %v1470_v2 = vpack.c.bf16 %v553_v0, %v551_v58  ;;  %v1518_v3 = vpack.c.bf16 %v673_v1, %v671_v59 }
 0x153   : > { %1188 = vst [vmem:[%s2111_s25 + $0xc] sm:$0xff] %v1470_v2  ;;  %1236 = vst [vmem:[%s2111_s25 + $0x12c] sm:$0xff] %v1518_v3  ;;  %v556_v4 = vpop.f32.mrb[4].mxu0  ;;  %v676_v5 = vpop.f32.mrb[4].mxu1  ;;  %v2151_v2 = vrot.slane %v2093_v44, %v283_v54 }
 0x154   : > { %v557_v6 = vadd.f32 %v556_v4, %v2097_v46  ;;  %v677_v7 = vadd.f32 %v676_v5, %v2097_v46  ;;  %v558_v8 = vpop.f32.mrb[5].mxu0  ;;  %v678_v9 = vpop.f32.mrb[5].mxu1 }
 0x155   : > { %v559_v10 = vadd.f32 %v558_v8, %v2100_v47  ;;  %v679_v11 = vadd.f32 %v678_v9, %v2100_v47  ;;  %v560_v12 = vpop.f32.mrb[6].mxu0  ;;  %v680_v13 = vpop.f32.mrb[6].mxu1 }
 0x156   : > { %v561_v14 = vadd.f32 %v560_v12, %v2097_v46  ;;  %v681_v15 = vadd.f32 %v680_v13, %v2097_v46  ;;  %v562_v16 = vpop.f32.mrb[7].mxu0  ;;  %v682_v17 = vpop.f32.mrb[7].mxu1 }
 0x157   : > { %v1472_v18 = vpack.c.bf16 %v559_v10, %v557_v6  ;;  %v1520_v19 = vpack.c.bf16 %v679_v11, %v677_v7  ;;  %v563_v20 = vadd.f32 %v562_v16, %v2100_v47  ;;  %v683_v21 = vadd.f32 %v682_v17, %v2100_v47 }
 0x159   : > { %1190 = vst [vmem:[%s2111_s25 + $0x18] sm:$0xff] %v1472_v18  ;;  %1238 = vst [vmem:[%s2111_s25 + $0x138] sm:$0xff] %v1520_v19  ;;  %v1474_v22 = vpack.c.bf16 %v563_v20, %v561_v14  ;;  %v1522_v23 = vpack.c.bf16 %v683_v21, %v681_v15 }
 0x15b   : > { %1192 = vst [vmem:[%s2111_s25 + $0x24] sm:$0xff] %v1474_v22  ;;  %1240 = vst [vmem:[%s2111_s25 + $0x144] sm:$0xff] %v1522_v23  ;;  %v566_v24 = vpop.f32.mrb[8].mxu0  ;;  %v686_v25 = vpop.f32.mrb[8].mxu1 }
 0x15c   : > { %v567_v26 = vadd.f32 %v566_v24, %v2097_v46  ;;  %v687_v27 = vadd.f32 %v686_v25, %v2097_v46  ;;  %v568_v28 = vpop.f32.mrb[9].mxu0  ;;  %v688_v29 = vpop.f32.mrb[9].mxu1 }
 0x15d   : > { %v569_v30 = vadd.f32 %v568_v28, %v2100_v47  ;;  %v689_v31 = vadd.f32 %v688_v29, %v2100_v47  ;;  %v570_v32 = vpop.f32.mrb[10].mxu0  ;;  %v690_v33 = vpop.f32.mrb[10].mxu1 }
 0x15e   : > { %v571_v34 = vadd.f32 %v570_v32, %v2097_v46  ;;  %v691_v35 = vadd.f32 %v690_v33, %v2097_v46  ;;  %v572_v36 = vpop.f32.mrb[11].mxu0  ;;  %v692_v37 = vpop.f32.mrb[11].mxu1 }
 0x15f   : > { %v1476_v38 = vpack.c.bf16 %v569_v30, %v567_v26  ;;  %v1524_v39 = vpack.c.bf16 %v689_v31, %v687_v27  ;;  %v573_v40 = vadd.f32 %v572_v36, %v2100_v47  ;;  %v693_v41 = vadd.f32 %v692_v37, %v2100_v47 }
 0x161   : > { %1194 = vst [vmem:[%s2111_s25 + $0x30] sm:$0xff] %v1476_v38  ;;  %1242 = vst [vmem:[%s2111_s25 + $0x150] sm:$0xff] %v1524_v39  ;;  %v1478_v43 = vpack.c.bf16 %v573_v40, %v571_v34  ;;  %v1526_v45 = vpack.c.bf16 %v693_v41, %v691_v35 }
 0x163   : > { %1196 = vst [vmem:[%s2111_s25 + $0x3c] sm:$0xff] %v1478_v43  ;;  %1244 = vst [vmem:[%s2111_s25 + $0x15c] sm:$0xff] %v1526_v45  ;;  %v576_v48 = vpop.f32.mrb[12].mxu0  ;;  %v696_v49 = vpop.f32.mrb[12].mxu1 }
 0x164   : > { %v577_v50 = vadd.f32 %v576_v48, %v2097_v46  ;;  %v697_v51 = vadd.f32 %v696_v49, %v2097_v46  ;;  %v578_v52 = vpop.f32.mrb[13].mxu0  ;;  %v698_v53 = vpop.f32.mrb[13].mxu1 }
 0x165   : > { %v579_v55 = vadd.f32 %v578_v52, %v2100_v47  ;;  %v699_v56 = vadd.f32 %v698_v53, %v2100_v47  ;;  %v580_v57 = vpop.f32.mrb[14].mxu0  ;;  %v700_v58 = vpop.f32.mrb[14].mxu1 }
 0x166   : > { %v581_v59 = vadd.f32 %v580_v57, %v2097_v46  ;;  %v701_v60 = vadd.f32 %v700_v58, %v2097_v46  ;;  %v582_v61 = vpop.f32.mrb[15].mxu0  ;;  %v702_v62 = vpop.f32.mrb[15].mxu1 }
 0x167   : > { %v1480_v63 = vpack.c.bf16 %v579_v55, %v577_v50  ;;  %v1528_v0 = vpack.c.bf16 %v699_v56, %v697_v51  ;;  %v583_v1 = vadd.f32 %v582_v61, %v2100_v47  ;;  %v703_v42 = vadd.f32 %v702_v62, %v2100_v47 }
 0x169   : > { %1198 = vst [vmem:[%s2111_s25 + $0x48] sm:$0xff] %v1480_v63  ;;  %1246 = vst [vmem:[%s2111_s25 + $0x168] sm:$0xff] %v1528_v0  ;;  %v1482_v3 = vpack.c.bf16 %v583_v1, %v581_v59  ;;  %v1530_v4 = vpack.c.bf16 %v703_v42, %v701_v60 }
 0x16b   : > { %1200 = vst [vmem:[%s2111_s25 + $0x54] sm:$0xff] %v1482_v3  ;;  %1248 = vst [vmem:[%s2111_s25 + $0x174] sm:$0xff] %v1530_v4  ;;  %v586_v5 = vpop.f32.mrb[16].mxu0  ;;  %v1574_v6 = vpop.f32.mrb[16].mxu1 }
 0x16c   : > { %v587_v7 = vadd.f32 %v586_v5, %v2097_v46  ;;  %v748_v8 = vadd.f32 %v1574_v6, %v2151_v2  ;;  %v588_v9 = vpop.f32.mrb[17].mxu0  ;;  %v739_v10 = vpop.f32.mrb[17].mxu1 }
 0x16d   : > { %v589_v11 = vadd.f32 %v588_v9, %v2100_v47  ;;  %v740_v44 = vadd.f32 %v739_v10, %v2151_v2  ;;  %v590_v12 = vpop.f32.mrb[18].mxu0  ;;  %v1575_v13 = vpop.f32.mrb[18].mxu1 }
 0x16e   : > { %v1473_v14 = vpack.c.bf16 %v748_v8, %v748_v8  ;;  %v591_v15 = vadd.f32 %v590_v12, %v2097_v46  ;;  %v751_v16 = vadd.f32 %v1575_v13, %v2151_v2  ;;  %v592_v17 = vpop.f32.mrb[19].mxu0  ;;  %v742_v18 = vpop.f32.mrb[19].mxu1 }
 0x16f   : > { %v1484_v19 = vpack.c.bf16 %v589_v11, %v587_v7  ;;  %v1469_v20 = vpack.c.bf16 %v740_v44, %v740_v44  ;;  %v593_v21 = vadd.f32 %v592_v17, %v2100_v47  ;;  %v743_v22 = vadd.f32 %v742_v18, %v2151_v2 }
 0x170   : > { %1191 = vst [vmem:[%s2111_s25 + $0x20] sm:$0xf] %v1473_v14  ;;  %v1475_v23 = vpack.c.bf16 %v751_v16, %v751_v16 }
 0x171   : > { %1202 = vst [vmem:[%s2111_s25 + $0x60] sm:$0xff] %v1484_v19  ;;  %1187 = vst [vmem:[%s2111_s25 + $0x8] sm:$0xf] %v1469_v20  ;;  %v1486_v24 = vpack.c.bf16 %v593_v21, %v591_v15  ;;  %v1471_v25 = vpack.c.bf16 %v743_v22, %v743_v22 }
 0x172   : > { %1193 = vst [vmem:[%s2111_s25 + $0x2c] sm:$0xf] %v1475_v23 }
 0x173   : > { %1204 = vst [vmem:[%s2111_s25 + $0x6c] sm:$0xff] %v1486_v24  ;;  %1189 = vst [vmem:[%s2111_s25 + $0x14] sm:$0xf] %v1471_v25  ;;  %v596_v26 = vpop.f32.mrb[20].mxu0  ;;  %v1578_v27 = vpop.f32.mrb[20].mxu1 }
 0x174   : > { %v597_v28 = vadd.f32 %v596_v26, %v2097_v46  ;;  %v764_v29 = vadd.f32 %v1578_v27, %v2151_v2  ;;  %v598_v30 = vpop.f32.mrb[21].mxu0  ;;  %v755_v31 = vpop.f32.mrb[21].mxu1 }
 0x175   : > { %v599_v32 = vadd.f32 %v598_v30, %v2100_v47  ;;  %v756_v33 = vadd.f32 %v755_v31, %v2151_v2  ;;  %v600_v34 = vpop.f32.mrb[22].mxu0  ;;  %v1579_v35 = vpop.f32.mrb[22].mxu1 }
 0x176   : > { %v1481_v36 = vpack.c.bf16 %v764_v29, %v764_v29  ;;  %v601_v37 = vadd.f32 %v600_v34, %v2097_v46  ;;  %v767_v38 = vadd.f32 %v1579_v35, %v2151_v2  ;;  %v602_v39 = vpop.f32.mrb[23].mxu0  ;;  %v758_v40 = vpop.f32.mrb[23].mxu1 }
 0x177   : > { %v1488_v41 = vpack.c.bf16 %v599_v32, %v597_v28  ;;  %v1477_v43 = vpack.c.bf16 %v756_v33, %v756_v33  ;;  %v603_v45 = vadd.f32 %v602_v39, %v2100_v47  ;;  %v759_v48 = vadd.f32 %v758_v40, %v2151_v2 }
 0x178   : > { %1199 = vst [vmem:[%s2111_s25 + $0x50] sm:$0xf] %v1481_v36  ;;  %v1483_v49 = vpack.c.bf16 %v767_v38, %v767_v38 }
 0x179   : > { %1206 = vst [vmem:[%s2111_s25 + $0x78] sm:$0xff] %v1488_v41  ;;  %1195 = vst [vmem:[%s2111_s25 + $0x38] sm:$0xf] %v1477_v43  ;;  %v1490_v50 = vpack.c.bf16 %v603_v45, %v601_v37  ;;  %v1479_v51 = vpack.c.bf16 %v759_v48, %v759_v48 }
 0x17a   : > { %1201 = vst [vmem:[%s2111_s25 + $0x5c] sm:$0xf] %v1483_v49 }
 0x17b   : > { %1208 = vst [vmem:[%s2111_s25 + $0x84] sm:$0xff] %v1490_v50  ;;  %1197 = vst [vmem:[%s2111_s25 + $0x44] sm:$0xf] %v1479_v51  ;;  %v606_v52 = vpop.f32.mrb[24].mxu0  ;;  %v1582_v53 = vpop.f32.mrb[24].mxu1 }
 0x17c   : > { %v607_v54 = vadd.f32 %v606_v52, %v2097_v46  ;;  %v780_v55 = vadd.f32 %v1582_v53, %v2151_v2  ;;  %v608_v56 = vpop.f32.mrb[25].mxu0  ;;  %v771_v57 = vpop.f32.mrb[25].mxu1 }
 0x17d   : > { %v609_v58 = vadd.f32 %v608_v56, %v2100_v47  ;;  %v772_v59 = vadd.f32 %v771_v57, %v2151_v2  ;;  %v610_v60 = vpop.f32.mrb[26].mxu0  ;;  %v1583_v61 = vpop.f32.mrb[26].mxu1 }
 0x17e   : > { %v1489_v62 = vpack.c.bf16 %v780_v55, %v780_v55  ;;  %v611_v63 = vadd.f32 %v610_v60, %v2097_v46  ;;  %v783_v0 = vadd.f32 %v1583_v61, %v2151_v2  ;;  %v612_v1 = vpop.f32.mrb[27].mxu0  ;;  %v774_v42 = vpop.f32.mrb[27].mxu1 }
 0x17f   : > { %v1492_v3 = vpack.c.bf16 %v609_v58, %v607_v54  ;;  %v1485_v4 = vpack.c.bf16 %v772_v59, %v772_v59  ;;  %v613_v5 = vadd.f32 %v612_v1, %v2100_v47  ;;  %v775_v6 = vadd.f32 %v774_v42, %v2151_v2 }
 0x180   : > { %1207 = vst [vmem:[%s2111_s25 + $0x80] sm:$0xf] %v1489_v62  ;;  %v1491_v7 = vpack.c.bf16 %v783_v0, %v783_v0 }
 0x181   : > { %1210 = vst [vmem:[%s2111_s25 + $0x90] sm:$0xff] %v1492_v3  ;;  %1203 = vst [vmem:[%s2111_s25 + $0x68] sm:$0xf] %v1485_v4  ;;  %v1494_v8 = vpack.c.bf16 %v613_v5, %v611_v63  ;;  %v1487_v9 = vpack.c.bf16 %v775_v6, %v775_v6 }
 0x182   : > { %1209 = vst [vmem:[%s2111_s25 + $0x8c] sm:$0xf] %v1491_v7 }
 0x183   : > { %1212 = vst [vmem:[%s2111_s25 + $0x9c] sm:$0xff] %v1494_v8  ;;  %1205 = vst [vmem:[%s2111_s25 + $0x74] sm:$0xf] %v1487_v9  ;;  %v616_v10 = vpop.f32.mrb[28].mxu0  ;;  %v1586_v11 = vpop.f32.mrb[28].mxu1 }
 0x184   : > { %v617_v44 = vadd.f32 %v616_v10, %v2097_v46  ;;  %v796_v12 = vadd.f32 %v1586_v11, %v2151_v2  ;;  %v618_v13 = vpop.f32.mrb[29].mxu0  ;;  %v787_v14 = vpop.f32.mrb[29].mxu1 }
 0x185   : > { %v619_v15 = vadd.f32 %v618_v13, %v2100_v47  ;;  %v788_v16 = vadd.f32 %v787_v14, %v2151_v2  ;;  %v620_v17 = vpop.f32.mrb[30].mxu0  ;;  %v1587_v18 = vpop.f32.mrb[30].mxu1 }
 0x186   : > { %v1497_v19 = vpack.c.bf16 %v796_v12, %v796_v12  ;;  %v621_v20 = vadd.f32 %v620_v17, %v2097_v46  ;;  %v799_v21 = vadd.f32 %v1587_v18, %v2151_v2  ;;  %v622_v22 = vpop.f32.mrb[31].mxu0  ;;  %v790_v23 = vpop.f32.mrb[31].mxu1 }
 0x187   : > { %v1496_v24 = vpack.c.bf16 %v619_v15, %v617_v44  ;;  %v1493_v25 = vpack.c.bf16 %v788_v16, %v788_v16  ;;  %v623_v26 = vadd.f32 %v622_v22, %v2100_v47  ;;  %v791_v27 = vadd.f32 %v790_v23, %v2151_v2 }
 0x188   : > { %1215 = vst [vmem:[%s2111_s25 + $0xb0] sm:$0xf] %v1497_v19  ;;  %v1499_v28 = vpack.c.bf16 %v799_v21, %v799_v21 }
 0x189   : > { %1214 = vst [vmem:[%s2111_s25 + $0xa8] sm:$0xff] %v1496_v24  ;;  %1211 = vst [vmem:[%s2111_s25 + $0x98] sm:$0xf] %v1493_v25  ;;  %v1498_v29 = vpack.c.bf16 %v623_v26, %v621_v20  ;;  %v1495_v30 = vpack.c.bf16 %v791_v27, %v791_v27 }
 0x18a   : > { %1217 = vst [vmem:[%s2111_s25 + $0xbc] sm:$0xf] %v1499_v28 }
 0x18b   : > { %1216 = vst [vmem:[%s2111_s25 + $0xb4] sm:$0xff] %v1498_v29  ;;  %1213 = vst [vmem:[%s2111_s25 + $0xa4] sm:$0xf] %v1495_v30  ;;  %v626_v31 = vpop.f32.mrb[32].mxu0  ;;  %v1590_v32 = vpop.f32.mrb[32].mxu1 }
 0x18c   : > { %v627_v33 = vadd.f32 %v626_v31, %v2097_v46  ;;  %v812_v34 = vadd.f32 %v1590_v32, %v2151_v2  ;;  %v628_v35 = vpop.f32.mrb[33].mxu0  ;;  %v803_v36 = vpop.f32.mrb[33].mxu1 }
 0x18d   : > { %v629_v37 = vadd.f32 %v628_v35, %v2100_v47  ;;  %v804_v38 = vadd.f32 %v803_v36, %v2151_v2  ;;  %v630_v39 = vpop.f32.mrb[34].mxu0  ;;  %v1591_v40 = vpop.f32.mrb[34].mxu1 }
 0x18e   : > { %v1505_v41 = vpack.c.bf16 %v812_v34, %v812_v34  ;;  %v631_v43 = vadd.f32 %v630_v39, %v2097_v46  ;;  %v815_v45 = vadd.f32 %v1591_v40, %v2151_v2  ;;  %v632_v48 = vpop.f32.mrb[35].mxu0  ;;  %v806_v49 = vpop.f32.mrb[35].mxu1 }
 0x18f   : > { %v1500_v50 = vpack.c.bf16 %v629_v37, %v627_v33  ;;  %v1501_v51 = vpack.c.bf16 %v804_v38, %v804_v38  ;;  %v633_v52 = vadd.f32 %v632_v48, %v2100_v47  ;;  %v807_v53 = vadd.f32 %v806_v49, %v2151_v2 }
 0x190   : > { %1223 = vst [vmem:[%s2111_s25 + $0xe0] sm:$0xf] %v1505_v41  ;;  %v1507_v54 = vpack.c.bf16 %v815_v45, %v815_v45 }
 0x191   : > { %1218 = vst [vmem:[%s2111_s25 + $0xc0] sm:$0xff] %v1500_v50  ;;  %1219 = vst [vmem:[%s2111_s25 + $0xc8] sm:$0xf] %v1501_v51  ;;  %v1502_v55 = vpack.c.bf16 %v633_v52, %v631_v43  ;;  %v1503_v56 = vpack.c.bf16 %v807_v53, %v807_v53 }
 0x192   : > { %1225 = vst [vmem:[%s2111_s25 + $0xec] sm:$0xf] %v1507_v54 }
 0x193   : > { %1220 = vst [vmem:[%s2111_s25 + $0xcc] sm:$0xff] %v1502_v55  ;;  %1221 = vst [vmem:[%s2111_s25 + $0xd4] sm:$0xf] %v1503_v56  ;;  %v636_v57 = vpop.f32.mrb[36].mxu0  ;;  %v1594_v58 = vpop.f32.mrb[36].mxu1 }
 0x194   : > { %v637_v59 = vadd.f32 %v636_v57, %v2097_v46  ;;  %v828_v60 = vadd.f32 %v1594_v58, %v2151_v2  ;;  %v638_v61 = vpop.f32.mrb[37].mxu0  ;;  %v819_v62 = vpop.f32.mrb[37].mxu1 }
 0x195   : > { %v639_v63 = vadd.f32 %v638_v61, %v2100_v47  ;;  %v820_v0 = vadd.f32 %v819_v62, %v2151_v2  ;;  %v640_v1 = vpop.f32.mrb[38].mxu0  ;;  %v1595_v42 = vpop.f32.mrb[38].mxu1 }
 0x196   : > { %v1513_v3 = vpack.c.bf16 %v828_v60, %v828_v60  ;;  %v641_v4 = vadd.f32 %v640_v1, %v2097_v46  ;;  %v831_v5 = vadd.f32 %v1595_v42, %v2151_v2  ;;  %v642_v6 = vpop.f32.mrb[39].mxu0  ;;  %v822_v7 = vpop.f32.mrb[39].mxu1 }
 0x197   : > { %v1504_v8 = vpack.c.bf16 %v639_v63, %v637_v59  ;;  %v1509_v9 = vpack.c.bf16 %v820_v0, %v820_v0  ;;  %v643_v10 = vadd.f32 %v642_v6, %v2100_v47  ;;  %v823_v11 = vadd.f32 %v822_v7, %v2151_v2 }
 0x198   : > { %1231 = vst [vmem:[%s2111_s25 + $0x110] sm:$0xf] %v1513_v3  ;;  %v1515_v44 = vpack.c.bf16 %v831_v5, %v831_v5 }
 0x199   : > { %1222 = vst [vmem:[%s2111_s25 + $0xd8] sm:$0xff] %v1504_v8  ;;  %1227 = vst [vmem:[%s2111_s25 + $0xf8] sm:$0xf] %v1509_v9  ;;  %v1506_v12 = vpack.c.bf16 %v643_v10, %v641_v4  ;;  %v1511_v13 = vpack.c.bf16 %v823_v11, %v823_v11 }
 0x19a   : > { %1233 = vst [vmem:[%s2111_s25 + $0x11c] sm:$0xf] %v1515_v44 }
 0x19b   : > { %1224 = vst [vmem:[%s2111_s25 + $0xe4] sm:$0xff] %v1506_v12  ;;  %1229 = vst [vmem:[%s2111_s25 + $0x104] sm:$0xf] %v1511_v13  ;;  %v646_v14 = vpop.f32.mrb[40].mxu0  ;;  %v1598_v15 = vpop.f32.mrb[40].mxu1 }
 0x19c   : > { %v647_v16 = vadd.f32 %v646_v14, %v2097_v46  ;;  %v844_v17 = vadd.f32 %v1598_v15, %v2151_v2  ;;  %v648_v18 = vpop.f32.mrb[41].mxu0  ;;  %v835_v19 = vpop.f32.mrb[41].mxu1 }
 0x19d   : > { %v649_v20 = vadd.f32 %v648_v18, %v2100_v47  ;;  %v836_v21 = vadd.f32 %v835_v19, %v2151_v2  ;;  %v650_v22 = vpop.f32.mrb[42].mxu0  ;;  %v1599_v23 = vpop.f32.mrb[42].mxu1 }
 0x19e   : > { %v1521_v24 = vpack.c.bf16 %v844_v17, %v844_v17  ;;  %v651_v25 = vadd.f32 %v650_v22, %v2097_v46  ;;  %v847_v26 = vadd.f32 %v1599_v23, %v2151_v2  ;;  %v652_v27 = vpop.f32.mrb[43].mxu0  ;;  %v838_v28 = vpop.f32.mrb[43].mxu1 }
 0x19f   : > { %v1508_v29 = vpack.c.bf16 %v649_v20, %v647_v16  ;;  %v1517_v30 = vpack.c.bf16 %v836_v21, %v836_v21  ;;  %v653_v31 = vadd.f32 %v652_v27, %v2100_v47  ;;  %v839_v32 = vadd.f32 %v838_v28, %v2151_v2 }
 0x1a0   : > { %1239 = vst [vmem:[%s2111_s25 + $0x140] sm:$0xf] %v1521_v24  ;;  %v1523_v33 = vpack.c.bf16 %v847_v26, %v847_v26 }
 0x1a1   : > { %1226 = vst [vmem:[%s2111_s25 + $0xf0] sm:$0xff] %v1508_v29  ;;  %1235 = vst [vmem:[%s2111_s25 + $0x128] sm:$0xf] %v1517_v30  ;;  %v1510_v34 = vpack.c.bf16 %v653_v31, %v651_v25  ;;  %v1519_v35 = vpack.c.bf16 %v839_v32, %v839_v32 }
 0x1a2   : > { %1241 = vst [vmem:[%s2111_s25 + $0x14c] sm:$0xf] %v1523_v33 }
 0x1a3   : > { %1228 = vst [vmem:[%s2111_s25 + $0xfc] sm:$0xff] %v1510_v34  ;;  %1237 = vst [vmem:[%s2111_s25 + $0x134] sm:$0xf] %v1519_v35  ;;  %v656_v36 = vpop.f32.mrb[44].mxu0  ;;  %v1602_v37 = vpop.f32.mrb[44].mxu1 }
 0x1a4   : > { %v657_v38 = vadd.f32 %v656_v36, %v2097_v46  ;;  %v860_v39 = vadd.f32 %v1602_v37, %v2151_v2  ;;  %v658_v40 = vpop.f32.mrb[45].mxu0  ;;  %v851_v41 = vpop.f32.mrb[45].mxu1 }
 0x1a5   : > { %v659_v43 = vadd.f32 %v658_v40, %v2100_v47  ;;  %v852_v45 = vadd.f32 %v851_v41, %v2151_v2  ;;  %v660_v48 = vpop.f32.mrb[46].mxu0  ;;  %v1603_v49 = vpop.f32.mrb[46].mxu1 }
 0x1a6   : > { %v1529_v50 = vpack.c.bf16 %v860_v39, %v860_v39  ;;  %v661_v51 = vadd.f32 %v660_v48, %v2097_v46  ;;  %v863_v52 = vadd.f32 %v1603_v49, %v2151_v2  ;;  %v662_v53 = vpop.f32.mrb[47].mxu0  ;;  %v854_v54 = vpop.f32.mrb[47].mxu1 }
 0x1a7   : > { %v1512_v55 = vpack.c.bf16 %v659_v43, %v657_v38  ;;  %v1525_v56 = vpack.c.bf16 %v852_v45, %v852_v45  ;;  %v663_v57 = vadd.f32 %v662_v53, %v2100_v47  ;;  %v855_v58 = vadd.f32 %v854_v54, %v2151_v2 }
 0x1a8   : > { %1247 = vst [vmem:[%s2111_s25 + $0x170] sm:$0xf] %v1529_v50  ;;  %v1531_v59 = vpack.c.bf16 %v863_v52, %v863_v52 }
 0x1a9   : > { %1230 = vst [vmem:[%s2111_s25 + $0x108] sm:$0xff] %v1512_v55  ;;  %1243 = vst [vmem:[%s2111_s25 + $0x158] sm:$0xf] %v1525_v56  ;;  %v1514_v46 = vpack.c.bf16 %v663_v57, %v661_v51  ;;  %v1527_v60 = vpack.c.bf16 %v855_v58, %v855_v58 }
 0x1aa   : > { %1249 = vst [vmem:[%s2111_s25 + $0x17c] sm:$0xf] %v1531_v59 }
 0x1ab   : > { %1232 = vst [vmem:[%s2111_s25 + $0x114] sm:$0xff] %v1514_v46  ;;  %1245 = vst [vmem:[%s2111_s25 + $0x164] sm:$0xf] %v1527_v60 }
 0x1ac   : > { %1805 = shalt.err (!%p1802_p7)
}
 0x1ad   : > { %s1806_s22 = scalar_lea.hbm %s2269_s11, 6144  ;;  %s1810_s9 = scalar_lea.hbm %s2323_s3, 12288 }
 0x1ae   : > { %p1807_p9 = scmp.ne.s32.totalorder %s2269_s11, %s1806_s22  ;;  %p1811_p5 = scmp.lt.u32.totalorder %s2269_s11, %s2323_s3 }
 0x1af   : > { %p1812_p11 = scmp.lt.u32.totalorder %s1810_s9, %s1806_s22  ;;  %p1814_p4 = scmp.lt.u32.totalorder %s1806_s22, %s2269_s11 }
 0x1b0   : > { %p1808_p2 = pnand %p1807_p9, %p1985_p12 }
 0x1b1   : > { %p1813_p1 = por %p1812_p11, %p1811_p5 }
 0x1b2   : > { %p1809_p0 = pneg %p1808_p2 }
 0x1b3   : > { %p1815_p6 = por %p1814_p4, %p1813_p1 }
 0x1b5   : > { %p1816_p8 = pnand %p1815_p6, %p1809_p0 }
 0x1b7   : > { %1819 = shalt.err (!%p1816_p8)
}
 0x1b8   : > { %s1872_s4 = smov 192   ;;  %s1873_s25 = smov 12  }
 0x1b9   : > { %1628 = dma.vmem_to_hbm [thread:$0]  (%p1985_p12), %s2271_s5, 6144, %s2269_s11, %s1251_s27, %s1872_s4, %s1872_s4, %s1873_s25  }
 0x1ba PF: > { %s1280_s26 = sand.u32 1, %s1850_s12   ;;  %p2338_p10 = scmp.ne.s32.totalorder %s2328_s19, 0 }
 0x1bb   : > { %p2339_p13 = scmp.ge.s32.totalorder %s1862_s15, 2  ;;  %s1281_s16 = scalar_lea.sflag [#allocation4], %s1280_s26 }
 0x1bd   : > { %p1639_p3 = pnand %p2339_p13, %p2338_p10 }
 0x1bf   : > { %1845 = dma.done.wait (!%p1639_p3), %s1281_s16, 6144  }
 0x1c0   : > { %1847 = vsyncadd (!%p1639_p3), %s1281_s16, 4294961152  ;;  %p17_p7 = scmp.ge.s32.totalorder %s1950_s24, 4   ;;  %s2340_s12 = smov %s1854_s13 }
 0x1c1   : > { %s2341_s13 = smov %s1858_s14  ;;  %s2342_s14 = smov %s1981_s17 }
 0x1c2   : > { %s2343_s15 = smov %s1950_s24  ;;  %19 = sbr.rel (!%p17_p7) target bundleno = 6 (0x6), region = 81 }
 0x1c9   :  { %1286 = vsyncpa [#allocation3], 1 }
 0x1ca   :  { %1288 = vsyncpa [#allocation3 + $0x1], 1 }
 0x1cb   :  { %1289 = vsyncpa [#allocation6], 1 }
 0x1cc   :  { %1290 = vsyncpa [#allocation4], 1 }
 0x1cd   :  { %1292 = vsyncpa [#allocation4 + $0x1], 1 }

</bundles_post_ra>
